<compile_context>
chip_gen: v6e
topology: v6e:2x2x1
jax: 0.10.0
libtpu: 0.0.40
codegen_flags: <defaults>
</compile_context>

<pallas_src>
import math

import jax
import jax.numpy as jnp
from jax import lax
from jax.experimental import pallas as pl
from jax.experimental.pallas import tpu as pltpu


# ----------------------------------------------------------------------------- kernels
def _noisy_linear_train_kernel(x_ref, wmu_ref, wsig_ref, eps_in_ref, eps_out_ref,
                               bias_ref, o_ref):
    """Grid = (B tiles, N tiles, K tiles); K is the reduction axis (innermost)."""
    k = pl.program_id(2)

    x = x_ref[...]                                   # (tb, tk), f32 or bf16
    xs = x * eps_in_ref[...]                         # row-scale by eps_in: O(tb*tk) VPU
    # Two standard (M,K)x(K,N) MXU contractions, f32 accumulation.
    mu_part = jnp.dot(x, wmu_ref[...], preferred_element_type=jnp.float32)
    sig_part = jnp.dot(xs, wsig_ref[...], preferred_element_type=jnp.float32)
    partial = mu_part + eps_out_ref[...] * sig_part  # column-scale by eps_out: O(tb*tn)

    @pl.when(k == 0)
    def _():
        o_ref[...] = partial + bias_ref[...]         # bias folded in once

    @pl.when(k > 0)
    def _():
        o_ref[...] += partial                        # output block stays VMEM-resident


def _noisy_linear_eval_kernel(x_ref, wmu_ref, bias_ref, o_ref):
    """Eval fast path: only mu / bias_mu are streamed from HBM."""
    k = pl.program_id(2)
    partial = jnp.dot(x_ref[...], wmu_ref[...], preferred_element_type=jnp.float32)

    @pl.when(k == 0)
    def _():
        o_ref[...] = partial + bias_ref[...]

    @pl.when(k > 0)
    def _():
        o_ref[...] += partial


# ----------------------------------------------------------------------------- wrapper
def _round_up(x, m):
    return ((x + m - 1) // m) * m


def _vmem_limit_bytes(tb, tn, tk, n_weight_arrays, mat_bytes):
    # Double-buffered inputs + resident f32 output tile, plus headroom.
    per_step = 2 * (tb * tk * mat_bytes
                    + n_weight_arrays * tk * tn * mat_bytes
                    + tb * tn * 4)
    # 32 MiB floor (v5e default scoped is only 16 MiB), 48 MiB cap (v7x physical = 64 MiB).
    return int(min(48 << 20, max(32 << 20, per_step + (8 << 20))))


def noisy_linear(x, weight_mu, weight_sigma, eps_out, eps_in,
                 bias_mu, bias_sigma, bias_epsilon,
                 *, training=True, use_bf16_matmul=False,
                 block_b=None, block_n=None, block_k=None):
    """NoisyLinear forward. Parameters are in PyTorch layout: weight_* is (out, in)."""
    B, in_f = x.shape
    out_f = weight_mu.shape[0]

    mat_dtype = jnp.bfloat16 if use_bf16_matmul else jnp.float32
    mat_bytes = jnp.dtype(mat_dtype).itemsize

    # ---- tile sizes (lane-dense, large blocks; single K tile for in_f <= 2048) ----
    in_128 = _round_up(in_f, 128)
    out_128 = _round_up(out_f, 128)
    tk = block_k if block_k is not None else (in_128 if in_128 <= 2048 else 1024)
    tn = block_n if block_n is not None else min(512, out_128)
    sublane = 16 if use_bf16_matmul else 8
    tb = block_b if block_b is not None else min(_round_up(B, sublane), 256)

    in_pad = _round_up(in_f, tk)
    out_pad = _round_up(out_f, tn)
    b_pad = _round_up(B, tb)
    grid = (b_pad // tb, out_pad // tn, in_pad // tk)

    def pad2(a, r, c):
        pr, pc = r - a.shape[0], c - a.shape[1]
        return jnp.pad(a, ((0, pr), (0, pc))) if (pr or pc) else a

    # ---- operands (bf16 cast done ONCE here, so the kernel DMAs the narrow dtype) ----
    x_p = pad2(x, b_pad, in_pad).astype(mat_dtype)
    # (K, N) weight layout feeds the MXU with a plain (M,K)x(K,N) contraction.
    wmu_t = pad2(weight_mu.T, in_pad, out_pad).astype(mat_dtype)

    # Effective bias is O(out_f): compute it in the wrapper, stream one (1, N) row.
    bias_eff = (bias_mu + bias_sigma * bias_epsilon) if training else bias_mu
    bias_p = pad2(bias_eff.reshape(1, out_f).astype(jnp.float32), 1, out_pad)

    n_mm = 2 if training else 1
    cost = pl.CostEstimate(
        flops=2 * n_mm * b_pad * in_pad * out_pad,
        transcendentals=0,
        bytes_accessed=int(mat_bytes * (n_mm * in_pad * out_pad + b_pad * in_pad + in_pad)
                           + 4 * (b_pad * out_pad + 2 * out_pad)),
    )
    compiler_params = pltpu.CompilerParams(
        dimension_semantics=("parallel", "parallel", "arbitrary"),
        vmem_limit_bytes=_vmem_limit_bytes(tb, tn, tk, n_mm, mat_bytes),
    )

    if training:
        wsig_t = pad2(weight_sigma.T, in_pad, out_pad).astype(mat_dtype)
        eps_in_p = pad2(eps_in.reshape(1, in_f), 1, in_pad).astype(mat_dtype)
        eps_out_p = pad2(eps_out.reshape(1, out_f).astype(jnp.float32), 1, out_pad)

        out = pl.pallas_call(
            _noisy_linear_train_kernel,
            out_shape=jax.ShapeDtypeStruct((b_pad, out_pad), jnp.float32),
            grid_spec=pltpu.PrefetchScalarGridSpec(
                num_scalar_prefetch=0,
                grid=grid,
                in_specs=[
                    pl.BlockSpec((tb, tk), lambda b, j, k: (b, k)),   # x
                    pl.BlockSpec((tk, tn), lambda b, j, k: (k, j)),   # mu.T
                    pl.BlockSpec((tk, tn), lambda b, j, k: (k, j)),   # sigma.T
                    pl.BlockSpec((1, tk), lambda b, j, k: (0, k)),    # eps_in (factorized)
                    pl.BlockSpec((1, tn), lambda b, j, k: (0, j)),    # eps_out (factorized)
                    pl.BlockSpec((1, tn), lambda b, j, k: (0, j)),    # effective bias
                ],
                out_specs=pl.BlockSpec((tb, tn), lambda b, j, k: (b, j)),
            ),
            compiler_params=compiler_params,
            cost_estimate=cost,
        )(x_p, wmu_t, wsig_t, eps_in_p, eps_out_p, bias_p)
    else:
        # Eval fast path: sigma / eps never leave HBM (they are not even padded).
        out = pl.pallas_call(
            _noisy_linear_eval_kernel,
            out_shape=jax.ShapeDtypeStruct((b_pad, out_pad), jnp.float32),
            grid_spec=pltpu.PrefetchScalarGridSpec(
                num_scalar_prefetch=0,
                grid=grid,
                in_specs=[
                    pl.BlockSpec((tb, tk), lambda b, j, k: (b, k)),   # x
                    pl.BlockSpec((tk, tn), lambda b, j, k: (k, j)),   # mu.T
                    pl.BlockSpec((1, tn), lambda b, j, k: (0, j)),    # bias_mu
                ],
                out_specs=pl.BlockSpec((tb, tn), lambda b, j, k: (b, j)),
            ),
            compiler_params=compiler_params,
            cost_estimate=cost,
        )(x_p, wmu_t, bias_p)

    return out[:B, :out_f]


# ----------------------------------------------------------------------------- params
def _scale_noise(key, size):
    v = jax.random.normal(key, (size,), dtype=jnp.float32)
    return jnp.sign(v) * jnp.sqrt(jnp.abs(v))


def init_noisy_linear(key, in_features, out_features, std_init=0.4):
    k1, k2, k3, k4, k5 = jax.random.split(key, 5)
    mu_range = 1.0 / math.sqrt(in_features)
    weight_mu = jax.random.uniform(
        k1, (out_features, in_features), minval=-mu_range, maxval=mu_range,
        dtype=jnp.float32)
    weight_sigma = jnp.full((out_features, in_features),
                            std_init / math.sqrt(in_features), dtype=jnp.float32)
    bias_mu = jax.random.uniform(
        k2, (out_features,), minval=-mu_range, maxval=mu_range, dtype=jnp.float32)
    bias_sigma = jnp.full((out_features,),
                          std_init / math.sqrt(out_features), dtype=jnp.float32)
    # reset_noise(): factorized Gaussian noise kept factorized (no dense outer product).
    eps_in = _scale_noise(k3, in_features)
    eps_out = _scale_noise(k4, out_features)
    bias_epsilon = _scale_noise(k5, out_features)
    return (weight_mu, weight_sigma, eps_out, eps_in,
            bias_mu, bias_sigma, bias_epsilon)


def _reference(x, wmu, wsig, eps_out, eps_in, bmu, bsig, beps, training=True):
    if training:
        w = wmu + wsig * jnp.outer(eps_out, eps_in)
        b = bmu + bsig * beps
    else:
        w, b = wmu, bmu
    return jnp.dot(x, w.T, precision=lax.Precision.HIGHEST) + b


# ----------------------------------------------------------------------------- demo
if __name__ == "__main__":
    key = jax.random.PRNGKey(0)
    kx1, kp1, kx2, kp2 = jax.random.split(key, 4)

    # Small NoisyLinear head (typical Noisy-DQN usage; exercises lane padding).
    B1, in1, out1 = 8, 32, 16
    x1 = jax.random.normal(kx1, (B1, in1), dtype=jnp.float32)
    p1 = init_noisy_linear(kp1, in1, out1, std_init=0.4)
    y1 = noisy_linear(x1, *p1)
    jax.block_until_ready(y1)
    assert y1.shape == (B1, out1)
    assert jnp.allclose(y1, _reference(x1, *p1), atol=1e-3, rtol=1e-3)

    # Same math with a forced (B, N, K) multi-tile grid to exercise the
    # K-reduction / direct-output accumulation path at small shapes.
    B2, in2, out2 = 16, 640, 384
    x2 = jax.random.normal(kx2, (B2, in2), dtype=jnp.float32)
    p2 = init_noisy_linear(kp2, in2, out2, std_init=0.4)
    y2 = noisy_linear(x2, *p2, block_b=8, block_n=128, block_k=128)
    jax.block_until_ready(y2)
    assert y2.shape == (B2, out2)
    assert jnp.allclose(y2, _reference(x2, *p2), atol=1e-3, rtol=1e-3)

    # Default large-tile path on the same shape (single K tile, no reduction).
    y2b = noisy_linear(x2, *p2)
    jax.block_until_ready(y2b)
    assert jnp.allclose(y2b, _reference(x2, *p2), atol=1e-3, rtol=1e-3)

    # Eval-mode fast path (mu / bias_mu only; sigma & noise skipped entirely).
    y_eval = noisy_linear(x1, *p1, training=False)
    jax.block_until_ready(y_eval)
    assert jnp.allclose(y_eval, _reference(x1, *p1, training=False),
                        atol=1e-3, rtol=1e-3)

    # Opt-in bf16 HBM storage of x / weights / eps_in (halves weight bandwidth);
    # f32 MXU accumulation kept, so compare with a relaxed tolerance.
    y_bf16 = noisy_linear(x2, *p2, use_bf16_matmul=True)
    jax.block_until_ready(y_bf16)
    assert jnp.allclose(y_bf16, _reference(x2, *p2), atol=5e-2, rtol=5e-2)

    print("KERNEL_OK")
</pallas_src>

<mosaic_0001>
module attributes {stable_mosaic.version = 11 : i64} {
  func.func @_noisy_linear_train_kernel(%arg0: i32, %arg1: i32, %arg2: i32, %arg3: memref<8x128xf32, #tpu.memory_space<vmem>>, %arg4: memref<128x128xf32, #tpu.memory_space<vmem>>, %arg5: memref<128x128xf32, #tpu.memory_space<vmem>>, %arg6: memref<1x128xf32, #tpu.memory_space<vmem>>, %arg7: memref<1x128xf32, #tpu.memory_space<vmem>>, %arg8: memref<1x128xf32, #tpu.memory_space<vmem>>, %arg9: memref<8x128xf32, #tpu.memory_space<vmem>>) attributes {dimension_semantics = [#tpu.dimension_semantics<parallel>, #tpu.dimension_semantics<parallel>, #tpu.dimension_semantics<arbitrary>], iteration_bounds = array<i64: 1, 1, 1>, scalar_prefetch = 0 : i64, scratch_operands = 0 : i64, tpu.core_type = #tpu.core_type<tc>, window_params = [{transform_indices = @transform_0, window_bounds = array<i64: 8, 128>}, {transform_indices = @transform_1, window_bounds = array<i64: 128, 128>}, {transform_indices = @transform_2, window_bounds = array<i64: 128, 128>}, {transform_indices = @transform_3, window_bounds = array<i64: 1, 128>}, {transform_indices = @transform_4, window_bounds = array<i64: 1, 128>}, {transform_indices = @transform_5, window_bounds = array<i64: 1, 128>}, {transform_indices = @transform_6, window_bounds = array<i64: 8, 128>}]} {
    %c0 = arith.constant 0 : index
    %c0_0 = arith.constant 0 : index
    %0 = vector.load %arg3[%c0, %c0_0] : memref<8x128xf32, #tpu.memory_space<vmem>>, vector<8x128xf32>
    %c0_1 = arith.constant 0 : index
    %c0_2 = arith.constant 0 : index
    %1 = vector.load %arg6[%c0_1, %c0_2] : memref<1x128xf32, #tpu.memory_space<vmem>>, vector<1x128xf32>
    %2 = vector.broadcast %1 : vector<1x128xf32> to vector<8x128xf32>
    %3 = arith.mulf %0, %2 : vector<8x128xf32>
    %c0_3 = arith.constant 0 : index
    %c0_4 = arith.constant 0 : index
    %4 = vector.load %arg4[%c0_3, %c0_4] : memref<128x128xf32, #tpu.memory_space<vmem>>, vector<128x128xf32>
    %cst = arith.constant dense<0.000000e+00> : vector<8x128xf32>
    %5 = tpu.matmul %0, %4, %cst {dimension_numbers = #tpu.dot_dimension_numbers<[1], [0], [0], [1], [0, 0, 1, 1], [], []>} : vector<8x128xf32>, vector<128x128xf32>, vector<8x128xf32> -> vector<8x128xf32>
    %c0_5 = arith.constant 0 : index
    %c0_6 = arith.constant 0 : index
    %6 = vector.load %arg5[%c0_5, %c0_6] : memref<128x128xf32, #tpu.memory_space<vmem>>, vector<128x128xf32>
    %cst_7 = arith.constant dense<0.000000e+00> : vector<8x128xf32>
    %7 = tpu.matmul %3, %6, %cst_7 {dimension_numbers = #tpu.dot_dimension_numbers<[1], [0], [0], [1], [0, 0, 1, 1], [], []>} : vector<8x128xf32>, vector<128x128xf32>, vector<8x128xf32> -> vector<8x128xf32>
    %c0_8 = arith.constant 0 : index
    %c0_9 = arith.constant 0 : index
    %8 = vector.load %arg7[%c0_8, %c0_9] : memref<1x128xf32, #tpu.memory_space<vmem>>, vector<1x128xf32>
    %9 = vector.broadcast %8 : vector<1x128xf32> to vector<8x128xf32>
    %10 = arith.mulf %9, %7 : vector<8x128xf32>
    %11 = arith.addf %5, %10 : vector<8x128xf32>
    %c0_i32 = arith.constant 0 : i32
    %12 = arith.cmpi eq, %arg2, %c0_i32 : i32
    %13 = arith.extui %12 : i1 to i32
    %c0_i32_10 = arith.constant 0 : i32
    %14 = arith.cmpi ne, %13, %c0_i32_10 : i32
    scf.if %14 {
      %c0_13 = arith.constant 0 : index
      %c0_14 = arith.constant 0 : index
      %18 = vector.load %arg8[%c0_13, %c0_14] : memref<1x128xf32, #tpu.memory_space<vmem>>, vector<1x128xf32>
      %19 = vector.broadcast %18 : vector<1x128xf32> to vector<8x128xf32>
      %20 = arith.addf %11, %19 : vector<8x128xf32>
      %c0_15 = arith.constant 0 : index
      %c0_16 = arith.constant 0 : index
      %21 = vector.load %arg9[%c0_15, %c0_16] : memref<8x128xf32, #tpu.memory_space<vmem>>, vector<8x128xf32>
      tpu.vector_store %arg9[%c0_15, %c0_16], %20 {strides = array<i32>} : memref<8x128xf32, #tpu.memory_space<vmem>>, vector<8x128xf32>,
    } else {
    }
    %c0_i32_11 = arith.constant 0 : i32
    %15 = arith.cmpi sgt, %arg2, %c0_i32_11 : i32
    %16 = arith.extui %15 : i1 to i32
    %c0_i32_12 = arith.constant 0 : i32
    %17 = arith.cmpi ne, %16, %c0_i32_12 : i32
    scf.if %17 {
      %c0_13 = arith.constant 0 : index
      %c0_14 = arith.constant 0 : index
      %18 = vector.load %arg9[%c0_13, %c0_14] : memref<8x128xf32, #tpu.memory_space<vmem>>, vector<8x128xf32>
      %19 = arith.addf %18, %11 : vector<8x128xf32>
      %c0_15 = arith.constant 0 : index
      %c0_16 = arith.constant 0 : index
      %20 = vector.load %arg9[%c0_15, %c0_16] : memref<8x128xf32, #tpu.memory_space<vmem>>, vector<8x128xf32>
      tpu.vector_store %arg9[%c0_15, %c0_16], %19 {strides = array<i32>} : memref<8x128xf32, #tpu.memory_space<vmem>>, vector<8x128xf32>,
    } else {
    }
    return
  }
  func.func @transform_0(%arg0: i32, %arg1: i32, %arg2: i32) -> (i32, i32) {
    %c0_i32 = arith.constant 0 : i32
    return %arg0, %arg2 : i32, i32
  }
  func.func @transform_1(%arg0: i32, %arg1: i32, %arg2: i32) -> (i32, i32) {
    %c0_i32 = arith.constant 0 : i32
    return %arg2, %arg1 : i32, i32
  }
  func.func @transform_2(%arg0: i32, %arg1: i32, %arg2: i32) -> (i32, i32) {
    %c0_i32 = arith.constant 0 : i32
    return %arg2, %arg1 : i32, i32
  }
  func.func @transform_3(%arg0: i32, %arg1: i32, %arg2: i32) -> (i32, i32) {
    %c0_i32 = arith.constant 0 : i32
    %c0_i32_0 = arith.constant 0 : i32
    return %c0_i32, %arg2 : i32, i32
  }
  func.func @transform_4(%arg0: i32, %arg1: i32, %arg2: i32) -> (i32, i32) {
    %c0_i32 = arith.constant 0 : i32
    %c0_i32_0 = arith.constant 0 : i32
    return %c0_i32, %arg1 : i32, i32
  }
  func.func @transform_5(%arg0: i32, %arg1: i32, %arg2: i32) -> (i32, i32) {
    %c0_i32 = arith.constant 0 : i32
    %c0_i32_0 = arith.constant 0 : i32
    return %c0_i32, %arg1 : i32, i32
  }
  func.func @transform_6(%arg0: i32, %arg1: i32, %arg2: i32) -> (i32, i32) {
    %c0_i32 = arith.constant 0 : i32
    return %arg0, %arg1 : i32, i32
  }
}

</mosaic_0001>

<bundles_post_ra>
// kernel: tpu_custom_call.1
= control target key start
LH: loop header
LB: loop body
LE: loop exit
PB: predicated region body
PF: predicated region fallthrough
CT: control target
= control target key end

     0   :  { %11 = vsyncpa [#allocation3], 0  ;;  %s587_s0 = inlined_call_operand.hbm [shape: f32[8,128], index: 0, kind: input, shape index: {}]   ;;  %s588_s1 = inlined_call_operand.hbm [shape: f32[128,128], index: 1, kind: input, shape index: {}]   ;;  %s589_s2 = inlined_call_operand.hbm [shape: f32[128,128], index: 2, kind: input, shape index: {}]   ;;  %s590_s3 = inlined_call_operand.vmem [shape: f32[1,128], index: 3, kind: input, shape index: {}]   ;;  %s591_s4 = inlined_call_operand.vmem [shape: f32[1,128], index: 4, kind: input, shape index: {}]   ;;  %s592_s5 = inlined_call_operand.vmem [shape: f32[1,128], index: 5, kind: input, shape index: {}]   ;;  %s593_s6 = inlined_call_operand.hbm [shape: f32[8,128], index: 6, kind: output, shape index: {}]  }
   0x1   :  { %12 = vsyncpa [#allocation6], 0 }
   0x2   :  { %13 = vsyncpa [#allocation4], 0  ;;  %s489_s21 = smov [#allocation5]  }
   0x3   :  { %s29_s22 = sshll.u32 %s489_s21, 4  ;;  %s30_s22 = int_to_ptr.vmem [resolvable:$true] %s29_s22 }
   0x4   :  { %s411_s23 = scalar_lea.vmem %s30_s22, 2048  ;;  %p416_p1 = scmp.lt.s32.totalorder %s30_s22, %s30_s22 }
   0x5   :  { %p412_p0 = scmp.ne.s32.totalorder %s30_s22, %s411_s23  ;;  %p417_p2 = scmp.lt.s32.totalorder %s411_s23, %s411_s23 }
   0x7   :  { %p418_p3 = por %p417_p2, %p416_p1 }
   0x9   :  { %p419_p4 = pnand %p418_p3, %p412_p0 }
   0xb   :  { %422 = shalt.err (!%p419_p4)
}
   0xc   :  { %s490_s24 = smov 128   ;;  %s491_s25 = smov 8  }
   0xd   :  { %35 = dma.hbm_to_vmem [thread:$0]  %s588_s1, 2048, %s30_s22, [#allocation6], %s490_s24, %s490_s24, %s491_s25  }
   0xe   :  { %s492_s28 = smov [#allocation2]   ;;  %s493_s30 = smov [#allocation7]  }
   0xf   :  { %s20_s29 = sshll.u32 %s492_s28, 4  ;;  %s41_s7 = sshll.u32 %s493_s30, 4  ;;  %s21_s29 = int_to_ptr.vmem [resolvable:$true] %s20_s29  ;;  %s42_s7 = int_to_ptr.vmem [resolvable:$true] %s41_s7 }
  0x10   :  { %s431_s8 = scalar_lea.vmem %s21_s29, 128  ;;  %p436_p6 = scmp.lt.s32.totalorder %s21_s29, %s21_s29 }
  0x11   :  { %p432_p5 = scmp.ne.s32.totalorder %s21_s29, %s431_s8  ;;  %p437_p7 = scmp.lt.s32.totalorder %s431_s8, %s431_s8 }
  0x13   :  { %p438_p8 = por %p437_p7, %p436_p6 }
  0x15   :  { %p439_p9 = pnand %p438_p8, %p432_p5 }
  0x17   :  { %442 = shalt.err (!%p439_p9)
}
  0x18   :  { %23 = dma.hbm_to_vmem [thread:$0]  %s587_s0, 128, %s21_s29, [#allocation3]  }
  0x19   :  { %s451_s11 = scalar_lea.vmem %s42_s7, 2048  ;;  %p456_p11 = scmp.lt.s32.totalorder %s42_s7, %s42_s7 }
  0x1a   :  { %p452_p10 = scmp.ne.s32.totalorder %s42_s7, %s451_s11  ;;  %p457_p12 = scmp.lt.s32.totalorder %s451_s11, %s451_s11 }
  0x1c   :  { %p458_p13 = por %p457_p12, %p456_p11 }
  0x1e   :  { %p459_p0 = pnand %p458_p13, %p452_p10 }
  0x20   :  { %462 = shalt.err (!%p459_p0)
}
  0x21   :  { %47 = dma.hbm_to_vmem [thread:$0]  %s589_s2, 2048, %s42_s7, [#allocation6], %s490_s24, %s490_s24, %s491_s25  }
  0x22   :  { %483 = dma.done.wait [#allocation3], 128  }
  0x23   :  { %484 = vsyncadd [#allocation3], 4294967168 }
  0x24   :  { %485 = dma.done.wait [#allocation6], 4096  }
  0x25   :  { %486 = vsyncadd [#allocation6], 4294963200  ;;  %v494_v0 = vmov 0.0   ;;  %vm495_vm0 = vmmov 0   ;;  %v103_v1 = vld [vmem:[#allocation7 + $0x78] sm:$0xff]  ;;  %v102_v3 = vld [vmem:[#allocation7 + $0x70] sm:$0xff] }
  0x26   :  { %325 = vmatprep.subr.mxu0 %v494_v0  ;;  %360 = vmatprep.subr.mxu1 %v494_v0  ;;  %v87_v2 = vld [vmem:[#allocation5 + $0x78] sm:$0xff]  ;;  %v86_v4 = vld [vmem:[#allocation5 + $0x70] sm:$0xff]  ;;  %v101_v5 = vld [vmem:[#allocation7 + $0x68] sm:$0xff]  ;;  %s496_s16 = smov [#allocation8]  }
  0x27   :  { %357 = vmatprep.mubr.msk.f32.mxu0 %vm495_vm0, %v494_v0  ;;  %392 = vmatprep.mubr.msk.f32.mxu1 %vm495_vm0, %v494_v0  ;;  %v85_v6 = vld [vmem:[#allocation5 + $0x68] sm:$0xff]  ;;  %v100_v7 = vld [vmem:[#allocation7 + $0x60] sm:$0xff]  ;;  %v99_v9 = vld [vmem:[#allocation7 + $0x58] sm:$0xff]  ;;  %s278_s17 = sshll.u32 %s496_s16, 4  ;;  %s279_s17 = int_to_ptr.vmem [resolvable:$true] %s278_s17 }
  0x28   :  { %326 = vmatpush3.msra.mxu0 %v103_v1  ;;  %361 = vmatpush3.msra.mxu1 %v87_v2  ;;  %v84_v8 = vld [vmem:[#allocation5 + $0x60] sm:$0xff]  ;;  %v83_v10 = vld [vmem:[#allocation5 + $0x58] sm:$0xff]  ;;  %v98_v11 = vld [vmem:[#allocation7 + $0x50] sm:$0xff]  ;;  %s463_s18 = scalar_lea.vmem %s279_s17, 128  ;;  %p468_p2 = scmp.lt.s32.totalorder %s279_s17, %s279_s17 }
  0x29   :  { %327 = vmatprep.subr.mxu0 %v494_v0  ;;  %362 = vmatprep.subr.mxu1 %v494_v0  ;;  %v82_v12 = vld [vmem:[#allocation5 + $0x50] sm:$0xff]  ;;  %v97_v13 = vld [vmem:[#allocation7 + $0x48] sm:$0xff]  ;;  %v96_v15 = vld [vmem:[#allocation7 + $0x40] sm:$0xff]  ;;  %p464_p1 = scmp.ne.s32.totalorder %s279_s17, %s463_s18  ;;  %p469_p3 = scmp.lt.s32.totalorder %s463_s18, %s463_s18 }
  0x2a   :  { %328 = vmatpush3.msra.mxu0 %v102_v3  ;;  %363 = vmatpush3.msra.mxu1 %v86_v4  ;;  %v81_v14 = vld [vmem:[#allocation5 + $0x48] sm:$0xff]  ;;  %v80_v16 = vld [vmem:[#allocation5 + $0x40] sm:$0xff]  ;;  %v95_v17 = vld [vmem:[#allocation7 + $0x38] sm:$0xff] }
  0x2b   :  { %329 = vmatprep.subr.mxu0 %v494_v0  ;;  %364 = vmatprep.subr.mxu1 %v494_v0  ;;  %v79_v18 = vld [vmem:[#allocation5 + $0x38] sm:$0xff]  ;;  %v94_v19 = vld [vmem:[#allocation7 + $0x30] sm:$0xff]  ;;  %v93_v21 = vld [vmem:[#allocation7 + $0x28] sm:$0xff]  ;;  %p470_p4 = por %p469_p3, %p468_p2 }
  0x2c   :  { %330 = vmatpush3.msra.mxu0 %v101_v5  ;;  %365 = vmatpush3.msra.mxu1 %v85_v6  ;;  %v78_v20 = vld [vmem:[#allocation5 + $0x30] sm:$0xff]  ;;  %v77_v22 = vld [vmem:[#allocation5 + $0x28] sm:$0xff]  ;;  %v92_v23 = vld [vmem:[#allocation7 + $0x20] sm:$0xff] }
  0x2d   :  { %331 = vmatprep.subr.mxu0 %v494_v0  ;;  %366 = vmatprep.subr.mxu1 %v494_v0  ;;  %v76_v24 = vld [vmem:[#allocation5 + $0x20] sm:$0xff]  ;;  %v91_v25 = vld [vmem:[#allocation7 + $0x18] sm:$0xff]  ;;  %v90_v27 = vld [vmem:[#allocation7 + $0x10] sm:$0xff]  ;;  %p471_p5 = pnand %p470_p4, %p464_p1 }
  0x2e   :  { %332 = vmatpush3.msra.mxu0 %v100_v7  ;;  %367 = vmatpush3.msra.mxu1 %v84_v8  ;;  %v75_v26 = vld [vmem:[#allocation5 + $0x18] sm:$0xff]  ;;  %v74_v28 = vld [vmem:[#allocation5 + $0x10] sm:$0xff]  ;;  %v89_v31 = vld [vmem:[#allocation7 + $0x8] sm:$0xff] }
  0x2f   :  { %333 = vmatprep.subr.mxu0 %v494_v0  ;;  %368 = vmatprep.subr.mxu1 %v494_v0  ;;  %v63_v29 = vld [vmem:[#allocation2] sm:$0xff]  ;;  %v73_v32 = vld [vmem:[#allocation5 + $0x8] sm:$0xff]  ;;  %v88_v33 = vld [vmem:[#allocation7] sm:$0xff] }
  0x30   :  { %334 = vmatpush3.msra.mxu0 %v99_v9  ;;  %369 = vmatpush3.msra.mxu1 %v83_v10  ;;  %v288_v30 = vld [vmem:[%s590_s3] ss:$0 sm:$0xff]  ;;  %v72_v34 = vld [vmem:[#allocation5] sm:$0xff] }
  0x31   :  { %335 = vmatprep.subr.mxu0 %v494_v0  ;;  %370 = vmatprep.subr.mxu1 %v494_v0  ;;  %v71_v35 = vmul.f32 %v288_v30, %v63_v29  ;;  %v289_v36 = vld [vmem:[%s591_s4] ss:$0 sm:$0xff] }
  0x32   :  { %336 = vmatpush3.msra.mxu0 %v98_v11  ;;  %371 = vmatpush3.msra.mxu1 %v82_v12  ;;  %v290_v40 = vld [vmem:[%s592_s5] ss:$0 sm:$0xff] }
  0x33   :  { %337 = vmatprep.subr.mxu0 %v494_v0  ;;  %372 = vmatprep.subr.mxu1 %v494_v0 }
  0x34   :  { %338 = vmatpush3.msra.mxu0 %v97_v13  ;;  %373 = vmatpush3.msra.mxu1 %v81_v14 }
  0x35   :  { %339 = vmatprep.subr.mxu0 %v494_v0  ;;  %374 = vmatprep.subr.mxu1 %v494_v0 }
  0x36   :  { %340 = vmatpush3.msra.mxu0 %v96_v15  ;;  %375 = vmatpush3.msra.mxu1 %v80_v16 }
  0x37   :  { %341 = vmatprep.subr.mxu0 %v494_v0  ;;  %376 = vmatprep.subr.mxu1 %v494_v0 }
  0x38   :  { %342 = vmatpush3.msra.mxu0 %v95_v17  ;;  %377 = vmatpush3.msra.mxu1 %v79_v18 }
  0x39   :  { %343 = vmatprep.subr.mxu0 %v494_v0  ;;  %378 = vmatprep.subr.mxu1 %v494_v0 }
  0x3a   :  { %344 = vmatpush3.msra.mxu0 %v94_v19  ;;  %379 = vmatpush3.msra.mxu1 %v78_v20 }
  0x3b   :  { %345 = vmatprep.subr.mxu0 %v494_v0  ;;  %380 = vmatprep.subr.mxu1 %v494_v0 }
  0x3c   :  { %346 = vmatpush3.msra.mxu0 %v93_v21  ;;  %381 = vmatpush3.msra.mxu1 %v77_v22 }
  0x3d   :  { %347 = vmatprep.subr.mxu0 %v494_v0  ;;  %382 = vmatprep.subr.mxu1 %v494_v0 }
  0x3e   :  { %348 = vmatpush3.msra.mxu0 %v92_v23  ;;  %383 = vmatpush3.msra.mxu1 %v76_v24 }
  0x3f   :  { %349 = vmatprep.subr.mxu0 %v494_v0  ;;  %384 = vmatprep.subr.mxu1 %v494_v0 }
  0x40   :  { %350 = vmatpush3.msra.mxu0 %v91_v25  ;;  %385 = vmatpush3.msra.mxu1 %v75_v26 }
  0x41   :  { %351 = vmatprep.subr.mxu0 %v494_v0  ;;  %386 = vmatprep.subr.mxu1 %v494_v0 }
  0x42   :  { %352 = vmatpush3.msra.mxu0 %v90_v27  ;;  %387 = vmatpush3.msra.mxu1 %v74_v28 }
  0x43   :  { %353 = vmatprep.subr.mxu0 %v494_v0  ;;  %388 = vmatprep.subr.mxu1 %v494_v0 }
  0x44   :  { %354 = vmatpush3.msra.mxu0 %v89_v31  ;;  %389 = vmatpush3.msra.mxu1 %v73_v32 }
  0x45   :  { %355 = vmatprep.subr.mxu0 %v494_v0  ;;  %390 = vmatprep.subr.mxu1 %v494_v0 }
  0x46   :  { %356 = vmatpush3.msra.mxu0 %v88_v33  ;;  %391 = vmatpush3.msra.mxu1 %v72_v34 }
  0x47   :  { %358 = vmatmul.mubr.f32.vlgmr.msra.gmra.mxu0 %v71_v35  ;;  %393 = vmatmul.mubr.f32.vlgmr.msra.gmra.mxu1 %v63_v29 }
 0x107   :  { %v170_v37 = vpop.f32.mrf.mxu0  ;;  %v248_v38 = vpop.f32.mrf.mxu1 }
 0x108   :  { %v181_v39 = vmul.f32 %v289_v36, %v170_v37 }
 0x109   :  { %v359_v41 = vpop.f32.mrf.mxu0  ;;  %v394_v42 = vpop.f32.mrf.mxu1 }
 0x10a   :  { %v249_v43 = vadd.f32 %v248_v38, %v181_v39 }
 0x10c   :  { %v263_v44 = vadd.f32 %v290_v40, %v249_v43 }
 0x10e   :  { %264 = vst [vmem:[#allocation8] sm:$0xff] %v263_v44 }
 0x10f   :  { %474 = shalt.err (!%p471_p5)
}
 0x110   :  { %281 = dma.vmem_to_hbm [thread:$0]  %s279_s17, 128, %s593_s6, [#allocation4]  }
 0x111   :  { %487 = dma.done.wait [#allocation4], 128  }
 0x112   :  { %488 = vsyncadd [#allocation4], 4294967168 }
 0x113   :  { %285 = vsyncpa [#allocation3], 1 }
 0x114   :  { %286 = vsyncpa [#allocation6], 1 }
 0x115   :  { %287 = vsyncpa [#allocation4], 1 }

</bundles_post_ra>
